<compile_context>
chip_gen: v7x
topology: tpu7x:2x2x1
jax: 0.10.0
libtpu: 0.0.40
codegen_flags: <defaults>
</compile_context>

<pallas_src>
import functools
import math

import jax
import jax.numpy as jnp
from jax.experimental import pallas as pl
from jax.experimental.pallas import tpu as pltpu


# Synthetic architecture (stands in for arch.txt):
#   input_len=32 ; Linear(32,64) ReLU ; Linear(64,64) Tanh ;
#   Linear(64,16) Sigmoid ; Linear(16,8)
ARCH = ["32", "64", "relu", "64", "tanh", "16", "sigmoid", "8"]

LANE = 128            # TPU lane width (last dim)
SUBLANE = 8           # f32 sublane count
MAX_BATCH_TILE = 1024  # rows per grid step for large batches


def _round_up(n, m):
    return ((n + m - 1) // m) * m


def parse_arch(arch):
    """Returns (in_len, out_len, linear_dims, ops) mirroring NeuralNetwork.__init__."""
    ops = []          # ("linear", idx) or ("relu"/"sigmoid"/"tanh", None), in order
    dims = []         # (fan_in, fan_out) per Linear
    in_len = int(arch[0])
    cur = in_len
    for a in arch[1:]:
        if a.isdigit():
            out_len = int(a)
            ops.append(("linear", len(dims)))
            dims.append((cur, out_len))
            cur = out_len
        elif a.lower() in ("relu", "sigmoid", "tanh"):
            ops.append((a.lower(), None))
    return in_len, cur, dims, ops


def build_params(dims, key):
    """Deterministic init matching nn.Linear default U(-1/sqrt(in), 1/sqrt(in)).

    Weights kept in PyTorch (out, in) layout here; transposed once in
    prepare_fused_params (never in the hot path).
    """
    params = []
    for fan_in, fan_out in dims:
        key, kw, kb = jax.random.split(key, 3)
        bound = 1.0 / math.sqrt(float(fan_in))
        w = jax.random.uniform(kw, (fan_out, fan_in), jnp.float32,
                               minval=-bound, maxval=bound)
        b = jax.random.uniform(kb, (fan_out,), jnp.float32,
                               minval=-bound, maxval=bound)
        params.append((w, b))
    return params


def prepare_fused_params(params, in_len):
    """One-time prep: transpose each weight to (in, out) and pad to kernel widths.

    * Layer 0 keeps its true K (= model input width): x is fed unpadded.
    * Hidden layers pad N (and therefore the next layer's K) to 128 lanes so
      intermediate activations are lane-dense vregs.
    * The LAST layer keeps its true N so the kernel writes a compact
      (batch, out_len) result (no padded writeback, no external slice).
    * Everything stays f32 for exact parity with the PyTorch f32 module.

    Correctness of lane padding relies on the padded K-rows of each weight
    being zero (so e.g. sigmoid(0)=0.5 in padded lanes is multiplied by zero
    in the next layer) — asserted below.
    """
    ws, bs = [], []
    num = len(params)
    k_width = in_len
    for li, (w, b) in enumerate(params):
        fan_out, fan_in = w.shape
        assert fan_in <= k_width, (fan_in, k_width)
        is_last = (li == num - 1)
        n_width = fan_out if is_last else _round_up(fan_out, LANE)
        wt = jnp.zeros((k_width, n_width), jnp.float32).at[:fan_in, :fan_out].set(w.T)
        bp = jnp.zeros((1, n_width), jnp.float32).at[0, :fan_out].set(b)
        if fan_in < k_width:
            # Padded rows must stay zero (kills padded-lane activations).
            assert float(jnp.max(jnp.abs(wt[fan_in:, :]))) == 0.0
        ws.append(wt)
        bs.append(bp)
        k_width = n_width
    return ws, bs


def _fused_mlp_kernel(*refs, ops, num_linear):
    """Whole MLP in one kernel invocation.

    refs = (x_ref, w_0..w_{L-1}, b_0..b_{L-1}, o_ref)
      x_ref: (TB, in_len) f32         (true feature width, no padding)
      w_i:   (K_i, N_i) f32           (pre-transposed; hidden N padded to 128,
                                       last N = out_len)
      b_i:   (1, N_i) f32
      o_ref: (TB, out_len) f32        (compact output)
    Intermediates live in vregs; matmuls are f32 x f32 -> f32 on the MXU.
    """
    x_ref = refs[0]
    o_ref = refs[-1]
    w_refs = refs[1:1 + num_linear]
    b_refs = refs[1 + num_linear:1 + 2 * num_linear]

    h = x_ref[...]
    for kind, idx in ops:
        if kind == "linear":
            h = jnp.dot(h, w_refs[idx][...], preferred_element_type=jnp.float32)
            h = h + b_refs[idx][...]            # (1,N) broadcast over rows
        elif kind == "relu":
            h = jnp.maximum(h, 0.0)
        elif kind == "sigmoid":
            h = jax.nn.sigmoid(h)
        elif kind == "tanh":
            h = jnp.tanh(h)
    o_ref[...] = h.astype(o_ref.dtype)


def mlp_forward(x, ws, bs, ops):
    """x: (B, in_len) f32. Returns (B, out_len) f32."""
    batch, in_f = x.shape
    assert in_f == ws[0].shape[0], (in_f, ws[0].shape)
    num_linear = len(ws)
    out_w = ws[-1].shape[1]          # true out_len (compact output)

    # Batch tiling: big tiles amortize the ~0.35us per-grid-step overhead and
    # approach HBM roofline; cap at MAX_BATCH_TILE rows and keep >= 2 grid
    # steps whenever the batch allows it so v7x's two TensorCores both get
    # work on the "parallel" axis. VMEM is a non-issue at these sizes on every
    # generation (weights + tiles << 64 MiB even at tb=1024).
    b_pad = _round_up(batch, SUBLANE)
    tb = min(MAX_BATCH_TILE, max(SUBLANE, _round_up(b_pad // 2, SUBLANE)))
    b_pad = _round_up(b_pad, tb)

    # Only pad batch rows when actually needed (no-op for the common case).
    if b_pad != batch:
        x_in = jnp.zeros((b_pad, in_f), x.dtype).at[:batch, :].set(x)
    else:
        x_in = x

    # x block last dim == full array dim (legal); weights/biases are
    # whole-array blocks pinned at (0, 0): DMA'd once, VMEM-resident across
    # all batch tiles. (pl.Buffered(1) could drop their unused second buffer,
    # but VMEM headroom is >20x here, so the extra constraint isn't worth it.)
    in_specs = [pl.BlockSpec((tb, in_f), lambda i: (i, 0))]
    in_specs += [pl.BlockSpec(w.shape, lambda i: (0, 0)) for w in ws]
    in_specs += [pl.BlockSpec(b.shape, lambda i: (0, 0)) for b in bs]

    kernel = functools.partial(_fused_mlp_kernel, ops=tuple(ops),
                               num_linear=num_linear)
    y = pl.pallas_call(
        kernel,
        out_shape=jax.ShapeDtypeStruct((b_pad, out_w), jnp.float32),
        grid=(b_pad // tb,),
        in_specs=in_specs,
        out_specs=pl.BlockSpec((tb, out_w), lambda i: (i, 0)),
        compiler_params=pltpu.CompilerParams(
            dimension_semantics=("parallel",)),
    )(x_in, *ws, *bs)
    return y if b_pad == batch else y[:batch]


def reference_forward_f32(x, params, ops):
    """Pure-JAX f32 reference mirroring torch nn.Sequential semantics exactly."""
    h = x
    for kind, idx in ops:
        if kind == "linear":
            w, b = params[idx]
            h = jnp.dot(h, w.T, precision=jax.lax.Precision.HIGHEST) + b
        elif kind == "relu":
            h = jnp.maximum(h, 0.0)
        elif kind == "sigmoid":
            h = jax.nn.sigmoid(h)
        elif kind == "tanh":
            h = jnp.tanh(h)
    return h


if __name__ == "__main__":
    key = jax.random.PRNGKey(0)
    key, kx = jax.random.split(key)

    in_len, out_len, dims, ops = parse_arch(ARCH)
    params = build_params(dims, key)             # PyTorch-layout f32 params
    ws, bs = prepare_fused_params(params, in_len)  # one-time transpose/pad

    batch = 8
    x = jax.random.normal(kx, (batch, in_len), jnp.float32)

    out = mlp_forward(x, ws, bs, ops)
    out = jax.block_until_ready(out)
    assert out.shape == (batch, out_len), out.shape

    # Kernel runs f32 end to end -> near-exact parity with the PyTorch f32
    # model; expect ~1e-6. Bound is generous only to tolerate MXU multi-pass
    # rounding differences across TPU generations.
    ref = reference_forward_f32(x, params, ops)
    err = float(jnp.max(jnp.abs(out - ref)))
    assert jnp.allclose(out, ref, atol=5e-3, rtol=5e-3), err

    print("KERNEL_OK")
</pallas_src>

<mosaic_0001>
module attributes {stable_mosaic.version = 11 : i64} {
  func.func @_fused_mlp_kernel(%arg0: i32, %arg1: memref<8x32xf32, #tpu.memory_space<vmem>>, %arg2: memref<32x128xf32, #tpu.memory_space<vmem>>, %arg3: memref<128x128xf32, #tpu.memory_space<vmem>>, %arg4: memref<128x128xf32, #tpu.memory_space<vmem>>, %arg5: memref<128x8xf32, #tpu.memory_space<vmem>>, %arg6: memref<1x128xf32, #tpu.memory_space<vmem>>, %arg7: memref<1x128xf32, #tpu.memory_space<vmem>>, %arg8: memref<1x128xf32, #tpu.memory_space<vmem>>, %arg9: memref<1x8xf32, #tpu.memory_space<vmem>>, %arg10: memref<8x8xf32, #tpu.memory_space<vmem>>) attributes {dimension_semantics = [#tpu.dimension_semantics<parallel>], iteration_bounds = array<i64: 1>, scalar_prefetch = 0 : i64, scratch_operands = 0 : i64, tpu.core_type = #tpu.core_type<tc>, window_params = [{transform_indices = @transform_0, window_bounds = array<i64: 8, 32>}, {pipeline_mode = #tpu.pipeline_mode<synchronous>, transform_indices = @transform_1, window_bounds = array<i64: 32, 128>}, {pipeline_mode = #tpu.pipeline_mode<synchronous>, transform_indices = @transform_2, window_bounds = array<i64: 128, 128>}, {pipeline_mode = #tpu.pipeline_mode<synchronous>, transform_indices = @transform_3, window_bounds = array<i64: 128, 128>}, {pipeline_mode = #tpu.pipeline_mode<synchronous>, transform_indices = @transform_4, window_bounds = array<i64: 128, 8>}, {pipeline_mode = #tpu.pipeline_mode<synchronous>, transform_indices = @transform_5, window_bounds = array<i64: 1, 128>}, {pipeline_mode = #tpu.pipeline_mode<synchronous>, transform_indices = @transform_6, window_bounds = array<i64: 1, 128>}, {pipeline_mode = #tpu.pipeline_mode<synchronous>, transform_indices = @transform_7, window_bounds = array<i64: 1, 128>}, {pipeline_mode = #tpu.pipeline_mode<synchronous>, transform_indices = @transform_8, window_bounds = array<i64: 1, 8>}, {transform_indices = @transform_9, window_bounds = array<i64: 8, 8>}]} {
    %c0 = arith.constant 0 : index
    %c0_0 = arith.constant 0 : index
    %0 = vector.load %arg1[%c0, %c0_0] : memref<8x32xf32, #tpu.memory_space<vmem>>, vector<8x32xf32>
    %c0_1 = arith.constant 0 : index
    %c0_2 = arith.constant 0 : index
    %1 = vector.load %arg2[%c0_1, %c0_2] : memref<32x128xf32, #tpu.memory_space<vmem>>, vector<32x128xf32>
    %cst = arith.constant dense<0.000000e+00> : vector<8x128xf32>
    %2 = tpu.matmul %0, %1, %cst {dimension_numbers = #tpu.dot_dimension_numbers<[1], [0], [0], [1], [0, 0, 1, 1], [], []>} : vector<8x32xf32>, vector<32x128xf32>, vector<8x128xf32> -> vector<8x128xf32>
    %c0_3 = arith.constant 0 : index
    %c0_4 = arith.constant 0 : index
    %3 = vector.load %arg6[%c0_3, %c0_4] : memref<1x128xf32, #tpu.memory_space<vmem>>, vector<1x128xf32>
    %4 = vector.broadcast %3 : vector<1x128xf32> to vector<8x128xf32>
    %5 = arith.addf %2, %4 : vector<8x128xf32>
    %cst_5 = arith.constant 0.000000e+00 : f32
    %6 = vector.broadcast %cst_5 : f32 to vector<8x128xf32>
    %7 = arith.maximumf %5, %6 : vector<8x128xf32>
    %c0_6 = arith.constant 0 : index
    %c0_7 = arith.constant 0 : index
    %8 = vector.load %arg3[%c0_6, %c0_7] : memref<128x128xf32, #tpu.memory_space<vmem>>, vector<128x128xf32>
    %cst_8 = arith.constant dense<0.000000e+00> : vector<8x128xf32>
    %9 = tpu.matmul %7, %8, %cst_8 {dimension_numbers = #tpu.dot_dimension_numbers<[1], [0], [0], [1], [0, 0, 1, 1], [], []>} : vector<8x128xf32>, vector<128x128xf32>, vector<8x128xf32> -> vector<8x128xf32>
    %c0_9 = arith.constant 0 : index
    %c0_10 = arith.constant 0 : index
    %10 = vector.load %arg7[%c0_9, %c0_10] : memref<1x128xf32, #tpu.memory_space<vmem>>, vector<1x128xf32>
    %11 = vector.broadcast %10 : vector<1x128xf32> to vector<8x128xf32>
    %12 = arith.addf %9, %11 : vector<8x128xf32>
    %13 = math.tanh %12 : vector<8x128xf32>
    %c0_11 = arith.constant 0 : index
    %c0_12 = arith.constant 0 : index
    %14 = vector.load %arg4[%c0_11, %c0_12] : memref<128x128xf32, #tpu.memory_space<vmem>>, vector<128x128xf32>
    %cst_13 = arith.constant dense<0.000000e+00> : vector<8x128xf32>
    %15 = tpu.matmul %13, %14, %cst_13 {dimension_numbers = #tpu.dot_dimension_numbers<[1], [0], [0], [1], [0, 0, 1, 1], [], []>} : vector<8x128xf32>, vector<128x128xf32>, vector<8x128xf32> -> vector<8x128xf32>
    %c0_14 = arith.constant 0 : index
    %c0_15 = arith.constant 0 : index
    %16 = vector.load %arg8[%c0_14, %c0_15] : memref<1x128xf32, #tpu.memory_space<vmem>>, vector<1x128xf32>
    %17 = vector.broadcast %16 : vector<1x128xf32> to vector<8x128xf32>
    %18 = arith.addf %15, %17 : vector<8x128xf32>
    %19 = arith.negf %18 : vector<8x128xf32>
    %20 = math.exp %19 : vector<8x128xf32>
    %cst_16 = arith.constant 1.000000e+00 : f32
    %21 = vector.broadcast %cst_16 : f32 to vector<8x128xf32>
    %22 = arith.addf %21, %20 : vector<8x128xf32>
    %23 = arith.divf %21, %22 : vector<8x128xf32>
    %c0_17 = arith.constant 0 : index
    %c0_18 = arith.constant 0 : index
    %24 = vector.load %arg5[%c0_17, %c0_18] : memref<128x8xf32, #tpu.memory_space<vmem>>, vector<128x8xf32>
    %cst_19 = arith.constant dense<0.000000e+00> : vector<8x8xf32>
    %25 = tpu.matmul %23, %24, %cst_19 {dimension_numbers = #tpu.dot_dimension_numbers<[1], [0], [0], [1], [0, 0, 1, 1], [], []>} : vector<8x128xf32>, vector<128x8xf32>, vector<8x8xf32> -> vector<8x8xf32>
    %c0_20 = arith.constant 0 : index
    %c0_21 = arith.constant 0 : index
    %26 = vector.load %arg9[%c0_20, %c0_21] : memref<1x8xf32, #tpu.memory_space<vmem>>, vector<1x8xf32>
    %27 = vector.broadcast %26 : vector<1x8xf32> to vector<8x8xf32>
    %28 = arith.addf %25, %27 : vector<8x8xf32>
    %c0_22 = arith.constant 0 : index
    %c0_23 = arith.constant 0 : index
    %29 = vector.load %arg10[%c0_22, %c0_23] : memref<8x8xf32, #tpu.memory_space<vmem>>, vector<8x8xf32>
    tpu.vector_store %arg10[%c0_22, %c0_23], %28 {strides = array<i32>} : memref<8x8xf32, #tpu.memory_space<vmem>>, vector<8x8xf32>,
    return
  }
  func.func @transform_0(%arg0: i32) -> (i32, i32) {
    %c0_i32 = arith.constant 0 : i32
    %c0_i32_0 = arith.constant 0 : i32
    return %arg0, %c0_i32 : i32, i32
  }
  func.func @transform_1(%arg0: i32) -> (i32, i32) {
    %c0_i32 = arith.constant 0 : i32
    %c0_i32_0 = arith.constant 0 : i32
    %c0_i32_1 = arith.constant 0 : i32
    return %c0_i32, %c0_i32_0 : i32, i32
  }
  func.func @transform_2(%arg0: i32) -> (i32, i32) {
    %c0_i32 = arith.constant 0 : i32
    %c0_i32_0 = arith.constant 0 : i32
    %c0_i32_1 = arith.constant 0 : i32
    return %c0_i32, %c0_i32_0 : i32, i32
  }
  func.func @transform_3(%arg0: i32) -> (i32, i32) {
    %c0_i32 = arith.constant 0 : i32
    %c0_i32_0 = arith.constant 0 : i32
    %c0_i32_1 = arith.constant 0 : i32
    return %c0_i32, %c0_i32_0 : i32, i32
  }
  func.func @transform_4(%arg0: i32) -> (i32, i32) {
    %c0_i32 = arith.constant 0 : i32
    %c0_i32_0 = arith.constant 0 : i32
    %c0_i32_1 = arith.constant 0 : i32
    return %c0_i32, %c0_i32_0 : i32, i32
  }
  func.func @transform_5(%arg0: i32) -> (i32, i32) {
    %c0_i32 = arith.constant 0 : i32
    %c0_i32_0 = arith.constant 0 : i32
    %c0_i32_1 = arith.constant 0 : i32
    return %c0_i32, %c0_i32_0 : i32, i32
  }
  func.func @transform_6(%arg0: i32) -> (i32, i32) {
    %c0_i32 = arith.constant 0 : i32
    %c0_i32_0 = arith.constant 0 : i32
    %c0_i32_1 = arith.constant 0 : i32
    return %c0_i32, %c0_i32_0 : i32, i32
  }
  func.func @transform_7(%arg0: i32) -> (i32, i32) {
    %c0_i32 = arith.constant 0 : i32
    %c0_i32_0 = arith.constant 0 : i32
    %c0_i32_1 = arith.constant 0 : i32
    return %c0_i32, %c0_i32_0 : i32, i32
  }
  func.func @transform_8(%arg0: i32) -> (i32, i32) {
    %c0_i32 = arith.constant 0 : i32
    %c0_i32_0 = arith.constant 0 : i32
    %c0_i32_1 = arith.constant 0 : i32
    return %c0_i32, %c0_i32_0 : i32, i32
  }
  func.func @transform_9(%arg0: i32) -> (i32, i32) {
    %c0_i32 = arith.constant 0 : i32
    %c0_i32_0 = arith.constant 0 : i32
    return %arg0, %c0_i32 : i32, i32
  }
}

</mosaic_0001>

<bundles_post_ra>
// kernel: tpu_custom_call.1
= control target key start
LH: loop header
LB: loop body
LE: loop exit
PB: predicated region body
PF: predicated region fallthrough
CT: control target
= control target key end

     0   :  { %14 = vsyncpa [#allocation3], 0  ;;  %s1033_s0 = inlined_call_operand.vmem [shape: f32[8,32], index: 0, kind: input, shape index: {}]   ;;  %s1034_s1 = inlined_call_operand.hbm [shape: f32[32,128], index: 1, kind: input, shape index: {}]   ;;  %s1035_s2 = inlined_call_operand.vmem [shape: f32[128,128], index: 2, kind: input, shape index: {}]   ;;  %s1036_s3 = inlined_call_operand.hbm [shape: f32[128,128], index: 3, kind: input, shape index: {}]   ;;  %s1037_s4 = inlined_call_operand.vmem [shape: f32[128,8], index: 4, kind: input, shape index: {}]   ;;  %s1038_s5 = inlined_call_operand.vmem [shape: f32[1,128], index: 5, kind: input, shape index: {}]   ;;  %s1039_s6 = inlined_call_operand.vmem [shape: f32[1,128], index: 6, kind: input, shape index: {}]   ;;  %s1040_s7 = inlined_call_operand.vmem [shape: f32[1,128], index: 7, kind: input, shape index: {}]   ;;  %s1041_s8 = inlined_call_operand.vmem [shape: f32[1,8], index: 8, kind: input, shape index: {}]   ;;  %s1042_s9 = inlined_call_operand.hbm [shape: f32[8,8], index: 9, kind: output, shape index: {}]  }
   0x1   :  { %15 = vsyncpa [#allocation6], 0 }
   0x2   :  { %16 = vsyncpa [#allocation4], 0  ;;  %s794_s30 = smov [#allocation2]   ;;  %s722_s13 = scalar_lea.hbm %s1034_s1, 512 }
   0x3   :  { %s24_s10 = sshll.u32 %s794_s30, 4  ;;  %p723_p0 = scmp.ne.s32.totalorder %s1034_s1, %s722_s13  ;;  %s25_s10 = int_to_ptr.vmem [resolvable:$true] %s24_s10 }
   0x4   :  { %p726_p1 = scmp.lt.u32.totalorder %s722_s13, %s1034_s1 }
   0x6   :  { %p728_p2 = pnand %p726_p1, %p723_p0 }
   0x8   :  { %731 = shalt.err (!%p728_p2)
}
   0x9   :  { %s732_s18 = scalar_lea.vmem %s25_s10, 512  ;;  %p737_p4 = scmp.lt.s32.totalorder %s25_s10, %s25_s10 }
   0xa   :  { %p733_p3 = scmp.ne.s32.totalorder %s25_s10, %s732_s18  ;;  %p738_p5 = scmp.lt.s32.totalorder %s732_s18, %s732_s18 }
   0xc   :  { %p739_p6 = por %p738_p5, %p737_p4 }
   0xe   :  { %p740_p7 = pnand %p739_p6, %p733_p3 }
  0x10   :  { %743 = shalt.err (!%p740_p7)
}
  0x11   :  { %s795_s19 = smov 128   ;;  %s796_s20 = smov 8  }
  0x12   :  { %30 = dma.hbm_to_vmem [thread:$0]  %s1034_s1, 512, %s25_s10, [#allocation3], %s795_s19, %s795_s19, %s796_s20  }
  0x13   :  { %s797_s23 = smov [#allocation5]   ;;  %s744_s27 = scalar_lea.hbm %s1036_s3, 2048 }
  0x14   :  { %s38_s24 = sshll.u32 %s797_s23, 4  ;;  %p745_p8 = scmp.ne.s32.totalorder %s1036_s3, %s744_s27  ;;  %s39_s24 = int_to_ptr.vmem [resolvable:$true] %s38_s24 }
  0x15   :  { %p748_p9 = scmp.lt.u32.totalorder %s744_s27, %s1036_s3 }
  0x17   :  { %p750_p10 = pnand %p748_p9, %p745_p8 }
  0x19   :  { %753 = shalt.err (!%p750_p10)
}
  0x1a   :  { %s754_s12 = scalar_lea.vmem %s39_s24, 2048  ;;  %p759_p12 = scmp.lt.s32.totalorder %s39_s24, %s39_s24 }
  0x1b   :  { %p755_p11 = scmp.ne.s32.totalorder %s39_s24, %s754_s12  ;;  %p760_p13 = scmp.lt.s32.totalorder %s754_s12, %s754_s12 }
  0x1d   :  { %p761_p0 = por %p760_p13, %p759_p12 }
  0x1f   :  { %p762_p1 = pnand %p761_p0, %p755_p11 }
  0x21   :  { %765 = shalt.err (!%p762_p1)
}
  0x22   :  { %44 = dma.hbm_to_vmem [thread:$0]  %s1036_s3, 2048, %s39_s24, [#allocation6], %s795_s19, %s795_s19, %s796_s20  }
  0x23   :  { %788 = dma.done.wait [#allocation3], 512  }
  0x24   :  { %789 = vsyncadd [#allocation3], 4294966784 }
  0x25   :  { %790 = dma.done.wait [#allocation6], 2048  }
  0x26   :  { %791 = vsyncadd [#allocation6], 4294965248  ;;  %v798_v0 = vmov 0.0|0.0   ;;  %vm799_vm0 = vmmov 0   ;;  %v800_v1 = vmov 0.0   ;;  %v62_v2 = vld [vmem:[#allocation2] sm:$0xff] }
  0x27   :  { %630 = vmatprep.subr.bf16.mxu0 %v798_v0  ;;  %522 = vmatprep.mubr.msk.f32.mxu0 %vm799_vm0, %v800_v1  ;;  %v63_v3 = vld [vmem:[#allocation2 + $0x8] sm:$0xff]  ;;  %v64_v4 = vld [vmem:[#allocation2 + $0x10] sm:$0xff]  ;;  %v65_v6 = vld [vmem:[#allocation2 + $0x18] sm:$0xff]  ;;  %vm73_vm1 = vcmask 261120   ;;  %s801_s11 = smov [#allocation7]   ;;  %vm434_vm2 = vcmask 64512  }
  0x28   :  { %636 = vmatprep.subr.bf16.mxu1 %v798_v0  ;;  %557 = vmatprep.mubr.msk.f32.mxu1 %vm799_vm0, %v800_v1  ;;  %v631_v5 = vpack.c.bf16 %v63_v3, %v62_v2  ;;  %v148_v7 = vld [vmem:[%s1035_s2] sm:$0xff]  ;;  %v149_v8 = vld [vmem:[%s1035_s2 + $0x8] sm:$0xff]  ;;  %v150_v9 = vld [vmem:[%s1035_s2 + $0x10] sm:$0xff]  ;;  %v634_v11 = vpack.c.bf16 %v65_v6, %v64_v4 }
  0x29   :  { %v151_v10 = vld [vmem:[%s1035_s2 + $0x18] sm:$0xff]  ;;  %v637_v12 = vpack.c.bf16 %v149_v8, %v148_v7  ;;  %v152_v14 = vld [vmem:[%s1035_s2 + $0x20] sm:$0xff]  ;;  %v153_v15 = vld [vmem:[%s1035_s2 + $0x28] sm:$0xff] }
  0x2a   :  { %632 = vmatpush3.bf16.msra.mxu0 %v631_v5  ;;  %v640_v13 = vpack.c.bf16 %v151_v10, %v150_v9  ;;  %v61_v16 = vld [vmem:[%s1033_s0] sm:$0xff]  ;;  %v643_v17 = vpack.c.bf16 %v153_v15, %v152_v14  ;;  %v154_v18 = vld [vmem:[%s1035_s2 + $0x30] sm:$0xff]  ;;  %v155_v19 = vld [vmem:[%s1035_s2 + $0x38] sm:$0xff] }
  0x2b   :  { %633 = vmatprep.subr.bf16.mxu0 %v798_v0  ;;  %638 = vmatpush3.bf16.msra.mxu1 %v637_v12  ;;  %v646_v20 = vpack.c.bf16 %v155_v19, %v154_v18  ;;  %v156_v21 = vld [vmem:[%s1035_s2 + $0x40] sm:$0xff]  ;;  %v157_v22 = vld [vmem:[%s1035_s2 + $0x48] sm:$0xff]  ;;  %v158_v24 = vld [vmem:[%s1035_s2 + $0x50] sm:$0xff] }
  0x2c   :  { %639 = vmatprep.subr.bf16.mxu1 %v798_v0  ;;  %v649_v23 = vpack.c.bf16 %v157_v22, %v156_v21  ;;  %v159_v25 = vld [vmem:[%s1035_s2 + $0x58] sm:$0xff]  ;;  %v160_v27 = vld [vmem:[%s1035_s2 + $0x60] sm:$0xff]  ;;  %v161_v28 = vld [vmem:[%s1035_s2 + $0x68] sm:$0xff] }
  0x2d   :  { %v652_v26 = vpack.c.bf16 %v159_v25, %v158_v24  ;;  %v655_v29 = vpack.c.bf16 %v161_v28, %v160_v27  ;;  %v162_v30 = vld [vmem:[%s1035_s2 + $0x70] sm:$0xff]  ;;  %v163_v31 = vld [vmem:[%s1035_s2 + $0x78] sm:$0xff]  ;;  %v242_v33 = vld [vmem:[#allocation5] sm:$0xff] }
  0x2e   :  { %635 = vmatpush3.bf16.msra.mxu0 %v634_v11  ;;  %v658_v32 = vpack.c.bf16 %v163_v31, %v162_v30  ;;  %v243_v34 = vld [vmem:[#allocation5 + $0x8] sm:$0xff]  ;;  %v244_v35 = vld [vmem:[#allocation5 + $0x10] sm:$0xff]  ;;  %v245_v37 = vld [vmem:[#allocation5 + $0x18] sm:$0xff] }
  0x2f   :  { %660 = vmatprep.subr.bf16.mxu0 %v798_v0  ;;  %641 = vmatpush3.bf16.msra.mxu1 %v640_v13  ;;  %v661_v36 = vpack.c.bf16 %v243_v34, %v242_v33  ;;  %v664_v38 = vpack.c.bf16 %v245_v37, %v244_v35  ;;  %v246_v39 = vld [vmem:[#allocation5 + $0x20] sm:$0xff]  ;;  %v247_v40 = vld [vmem:[#allocation5 + $0x28] sm:$0xff]  ;;  %v248_v42 = vld [vmem:[#allocation5 + $0x30] sm:$0xff] }
  0x30   :  { %642 = vmatprep.subr.bf16.mxu1 %v798_v0  ;;  %v667_v41 = vpack.c.bf16 %v247_v40, %v246_v39  ;;  %v249_v43 = vld [vmem:[#allocation5 + $0x38] sm:$0xff]  ;;  %v250_v45 = vld [vmem:[#allocation5 + $0x40] sm:$0xff]  ;;  %v251_v46 = vld [vmem:[#allocation5 + $0x48] sm:$0xff] }
  0x31   :  { %523 = vmatmul.mubr.msk.f32.vlgmr.msra.gmra.mrb[0].mxu0 %vm73_vm1, %v61_v16  ;;  %v670_v44 = vpack.c.bf16 %v249_v43, %v248_v42  ;;  %v673_v47 = vpack.c.bf16 %v251_v46, %v250_v45  ;;  %v452_v48 = vld [vmem:[%s1038_s5] ss:$0 sm:$0xff]  ;;  %v252_v53 = vld [vmem:[#allocation5 + $0x50] sm:$0xff]  ;;  %v253_v54 = vld [vmem:[#allocation5 + $0x58] sm:$0xff] }
  0x32   :  { %592 = vmatprep.mubr.msk.f32.mxu0 %vm799_vm0, %v800_v1  ;;  %662 = vmatpush3.bf16.msra.mxu0 %v661_v36  ;;  %v676_v55 = vpack.c.bf16 %v253_v54, %v252_v53  ;;  %v254_v56 = vld [vmem:[#allocation5 + $0x60] sm:$0xff]  ;;  %v255_v57 = vld [vmem:[#allocation5 + $0x68] sm:$0xff]  ;;  %v256_v59 = vld [vmem:[#allocation5 + $0x70] sm:$0xff] }
  0x33   :  { %644 = vmatpush3.bf16.msra.mxu1 %v643_v17  ;;  %663 = vmatprep.subr.bf16.mxu0 %v798_v0  ;;  %v679_v58 = vpack.c.bf16 %v255_v57, %v254_v56  ;;  %v257_v60 = vld [vmem:[#allocation5 + $0x78] sm:$0xff]  ;;  %v341_v62 = vld [vmem:[%s1037_s4] sm:$0xff]  ;;  %v342_v63 = vld [vmem:[%s1037_s4 + $0x8] sm:$0xff] }
  0x34   :  { %645 = vmatprep.subr.bf16.mxu1 %v798_v0  ;;  %v682_v61 = vpack.c.bf16 %v257_v60, %v256_v59  ;;  %v454_v2 = vld [vmem:[%s1039_s6] ss:$0 sm:$0xff]  ;;  %v343_v7 = vld [vmem:[%s1037_s4 + $0x10] sm:$0xff]  ;;  %v344_v8 = vld [vmem:[%s1037_s4 + $0x18] sm:$0xff]  ;;  %s442_s6 = sshll.u32 %s801_s11, 4  ;;  %s443_s6 = int_to_ptr.vmem [resolvable:$true] %s442_s6 }
  0x35   :  { %v688_v9 = vpack.c.bf16 %v344_v8, %v343_v7  ;;  %v345_v10 = vld [vmem:[%s1037_s4 + $0x20] sm:$0xff]  ;;  %v346_v11 = vld [vmem:[%s1037_s4 + $0x28] sm:$0xff]  ;;  %v347_v13 = vld [vmem:[%s1037_s4 + $0x30] sm:$0xff]  ;;  %p771_p3 = scmp.lt.s32.totalorder %s443_s6, %s443_s6 }
  0x36   :  { %665 = vmatpush3.bf16.msra.mxu0 %v664_v38  ;;  %v691_v12 = vpack.c.bf16 %v346_v11, %v345_v10  ;;  %v348_v14 = vld [vmem:[%s1037_s4 + $0x38] sm:$0xff]  ;;  %v349_v16 = vld [vmem:[%s1037_s4 + $0x40] sm:$0xff]  ;;  %v350_v17 = vld [vmem:[%s1037_s4 + $0x48] sm:$0xff] }
  0x37   :  { %647 = vmatpush3.bf16.msra.mxu1 %v646_v20  ;;  %666 = vmatprep.subr.bf16.mxu0 %v798_v0  ;;  %v694_v15 = vpack.c.bf16 %v348_v14, %v347_v13  ;;  %v697_v18 = vpack.c.bf16 %v350_v17, %v349_v16  ;;  %v351_v19 = vld [vmem:[%s1037_s4 + $0x50] sm:$0xff]  ;;  %v352_v20 = vld [vmem:[%s1037_s4 + $0x58] sm:$0xff]  ;;  %v353_v22 = vld [vmem:[%s1037_s4 + $0x60] sm:$0xff] }
  0x38   :  { %648 = vmatprep.subr.bf16.mxu1 %v798_v0  ;;  %v700_v21 = vpack.c.bf16 %v352_v20, %v351_v19  ;;  %v355_v25 = vld [vmem:[%s1037_s4 + $0x70] sm:$0xff]  ;;  %v455_v28 = vld [vmem:[%s1040_s7] ss:$0 sm:$0xff]  ;;  %s766_s7 = scalar_lea.vmem %s443_s6, 128 }
  0x39   :  { %v457_v36 = vld [vmem:[%s1041_s8] ss:$0 sm:$0xff]  ;;  %p767_p2 = scmp.ne.s32.totalorder %s443_s6, %s766_s7  ;;  %p772_p4 = scmp.lt.s32.totalorder %s766_s7, %s766_s7 }
  0x3a   :  { %668 = vmatpush3.bf16.msra.mxu0 %v667_v41 }
  0x3b   :  { %650 = vmatpush3.bf16.msra.mxu1 %v649_v23  ;;  %669 = vmatprep.subr.bf16.mxu0 %v798_v0  ;;  %v354_v23 = vld [vmem:[%s1037_s4 + $0x68] sm:$0xff]  ;;  %p773_p5 = por %p772_p4, %p771_p3 }
  0x3c   :  { %651 = vmatprep.subr.bf16.mxu1 %v798_v0  ;;  %v703_v24 = vpack.c.bf16 %v354_v23, %v353_v22 }
  0x3d   :  { %p774_p6 = pnand %p773_p5, %p767_p2 }
  0x3e   :  { %671 = vmatpush3.bf16.msra.mxu0 %v670_v44 }
  0x3f   :  { %653 = vmatpush3.bf16.msra.mxu1 %v652_v26  ;;  %672 = vmatprep.subr.bf16.mxu0 %v798_v0  ;;  %v356_v26 = vld [vmem:[%s1037_s4 + $0x78] sm:$0xff] }
  0x40   :  { %654 = vmatprep.subr.bf16.mxu1 %v798_v0  ;;  %v706_v27 = vpack.c.bf16 %v356_v26, %v355_v25 }
  0x42   :  { %674 = vmatpush3.bf16.msra.mxu0 %v673_v47 }
  0x43   :  { %656 = vmatpush3.bf16.msra.mxu1 %v655_v29  ;;  %675 = vmatprep.subr.bf16.mxu0 %v798_v0 }
  0x44   :  { %657 = vmatprep.subr.bf16.mxu1 %v798_v0 }
  0x46   :  { %677 = vmatpush3.bf16.msra.mxu0 %v676_v55 }
  0x47   :  { %659 = vmatpush3.bf16.msra.mxu1 %v658_v32  ;;  %678 = vmatprep.subr.bf16.mxu0 %v798_v0 }
  0x48   :  { %684 = vmatprep.subr.bf16.mxu1 %v798_v0 }
  0x4a   :  { %680 = vmatpush3.bf16.msra.mxu0 %v679_v58 }
  0x4b   :  { %681 = vmatprep.subr.bf16.mxu0 %v798_v0 }
  0x4e   :  { %683 = vmatpush3.bf16.msra.mxu0 %v682_v61 }
 0x104   :  { %v143_v49 = vpop.f32.mrb[0].mxu0 }
 0x105   :  { %v144_v50 = vadd.f32 %v452_v48, %v143_v49  ;;  %v524_v51 = vpop.f32.mrb[1].mxu0 }
 0x107   :  { %v147_v52 = vmax.f32 %v144_v50, 0.0 }
 0x109   :  { %558 = vmatmul.mubr.f32.vlgmr.msra.gmra.mrb[0].mxu1 %v147_v52 }
 0x10a   :  { %627 = vmatprep.mubr.msk.f32.mxu1 %vm799_vm0, %v800_v1  ;;  %v685_v1 = vpack.c.bf16 %v342_v63, %v341_v62 }
 0x10c   :  { %686 = vmatpush3.bf16.msra.mxu1 %v685_v1 }
 0x10d   :  { %687 = vmatprep.subr.bf16.mxu1 %v798_v0 }
 0x110   :  { %689 = vmatpush3.bf16.msra.mxu1 %v688_v9 }
 0x111   :  { %690 = vmatprep.subr.bf16.mxu1 %v798_v0 }
 0x114   :  { %692 = vmatpush3.bf16.msra.mxu1 %v691_v12 }
 0x115   :  { %693 = vmatprep.subr.bf16.mxu1 %v798_v0 }
 0x118   :  { %695 = vmatpush3.bf16.msra.mxu1 %v694_v15 }
 0x119   :  { %696 = vmatprep.subr.bf16.mxu1 %v798_v0 }
 0x11c   :  { %698 = vmatpush3.bf16.msra.mxu1 %v697_v18 }
 0x11d   :  { %699 = vmatprep.subr.bf16.mxu1 %v798_v0 }
 0x120   :  { %701 = vmatpush3.bf16.msra.mxu1 %v700_v21 }
 0x121   :  { %702 = vmatprep.subr.bf16.mxu1 %v798_v0 }
 0x124   :  { %704 = vmatpush3.bf16.msra.mxu1 %v703_v24 }
 0x125   :  { %705 = vmatprep.subr.bf16.mxu1 %v798_v0 }
 0x128   :  { %707 = vmatpush3.bf16.msra.mxu1 %v706_v27 }
 0x1dc   :  { %v237_v3 = vpop.f32.mrb[0].mxu1 }
 0x1dd   :  { %v238_v4 = vadd.f32 %v454_v2, %v237_v3  ;;  %v559_v5 = vpop.f32.mrb[1].mxu1 }
 0x1df   :  { %716 = vtanh.f32 %v238_v4 }
 0x1e9   :  { %v717_v6 = vpop.eup %716 }
 0x1ea   :  { %593 = vmatmul.mubr.f32.vlgmr.msra.gmra.mrb[2].mxu0 %v717_v6 }
 0x2bd   :  { %v331_v29 = vpop.f32.mrb[2].mxu0 }
 0x2be   :  { %v332_v30 = vadd.f32 %v455_v28, %v331_v29  ;;  %v594_v31 = vpop.f32.mrb[3].mxu0 }
 0x2c0   :  { %v456_v32 = vmul.f32 -1.442695, %v332_v30 }
 0x2c2   :  { %718 = vpow2.f32 %v456_v32 }
 0x2cc   :  { %v719_v33 = vpop.eup %718 }
 0x2cd   :  { %v338_v34 = vadd.f32 1.0, %v719_v33 }
 0x2cf   :  { %720 = vrcp.f32 %v338_v34 }
 0x2d9   :  { %v721_v35 = vpop.eup %720 }
 0x2da   :  { %628 = vmatmul.mubr.f32.vlgmr.msra.gmra.mrb[2].mxu1 %v721_v35 }
 0x3ad   :  { %v430_v0 = vpop.f32.mrb[2].mxu1 }
 0x3ae   :  { %v431_v37 = vadd.f32 %v457_v36, %v430_v0  ;;  %v629_v38 = vpop.f32.mrb[3].mxu1 }
 0x3b0   :  { %435 = vst.msk [vmem:[#allocation7] sm:$0xff] %vm434_vm2, %v431_v37 }
 0x3b1   :  { %777 = shalt.err (!%p774_p6)
}
 0x3b2   :  { %s778_s10 = scalar_lea.hbm %s1042_s9, 128 }
 0x3b3   :  { %p779_p7 = scmp.ne.s32.totalorder %s1042_s9, %s778_s10  ;;  %p782_p8 = scmp.lt.u32.totalorder %s778_s10, %s1042_s9 }
 0x3b5   :  { %p784_p9 = pnand %p782_p8, %p779_p7 }
 0x3b7   :  { %787 = shalt.err (!%p784_p9)
}
 0x3b8   :  { %445 = dma.vmem_to_hbm [thread:$0]  %s443_s6, 128, %s1042_s9, [#allocation4]  }
 0x3b9   :  { %792 = dma.done.wait [#allocation4], 128  }
 0x3ba   :  { %793 = vsyncadd [#allocation4], 4294967168 }
 0x3bb   :  { %449 = vsyncpa [#allocation3], 1 }
 0x3bc   :  { %450 = vsyncpa [#allocation6], 1 }
 0x3bd   :  { %451 = vsyncpa [#allocation4], 1 }

</bundles_post_ra>
